<compile_context>
chip_gen: v6e
topology: v6e:2x2x1
jax: 0.10.0
libtpu: 0.0.40
codegen_flags: <defaults>
</compile_context>

<pallas_src>
import functools

import numpy as np
import jax
import jax.numpy as jnp
from jax import lax
from jax.experimental import pallas as pl
from jax.experimental.pallas import tpu as pltpu


# ----------------------------- Pallas kernel -------------------------------

def _clip_attn_cam_kernel(attn_ref, mc_ref, uh_ref, uwt_ref, out_ref, *, hg, wg):
    # attn_ref : (8, N, N) bf16 -- last-8-layer attention weights, CLS stripped
    # mc_ref   : (1, N)    f32  -- aff_mask * grayscale_cam, flattened row-major (lane-dense)
    # uh_ref   : (H, hg)   f32  -- bilinear row-upsample matrix
    # uwt_ref  : (wg, W)   f32  -- bilinear col-upsample matrix (already transposed)
    # out_ref  : (H, W)    f32  -- refined + upsampled + normalized CAM
    n = hg * wg

    # Running accumulation of the last-8 attention maps (bf16 load, f32 add).
    # Sum instead of mean: the first Sinkhorn column normalization cancels the
    # /8 exactly. Keeps only ~2 (N,N) f32 tiles live -> no vreg spill.
    def _acc(l, acc):
        return acc + attn_ref[l].astype(jnp.float32)

    trans = lax.fori_loop(0, 8, _acc, jnp.zeros((n, n), jnp.float32), unroll=True)

    # Sinkhorn normalization, matching torch order: dim=0 (cols) then dim=1
    # (rows), 3 pairs total (one explicit pair + `for _ in range(2)`).
    # Reciprocal-multiply keeps the N^2 divides off the VPU (EUP is idle here);
    # approx reciprocal drifts ~2^-12 from the torch reference (fine for seeds).
    for _ in range(3):
        col_inv = pl.reciprocal(jnp.sum(trans, axis=0, keepdims=True), approx=True)
        trans = trans * col_inv                                           # (N,N)*(1,N)
        row_inv = pl.reciprocal(jnp.sum(trans, axis=1, keepdims=True), approx=True)
        trans = trans * row_inv                                           # (N,N)*(N,1)

    # Symmetrize; the *0.5 is a global scale cancelled by the final _normalize.
    trans = trans + trans.T
    # `for _ in range(1): trans_mat = trans_mat @ trans_mat`
    trans = jnp.dot(trans, trans, preferred_element_type=jnp.float32)     # (N, N)

    # (trans * aff_mask) @ cam_col  ==  sum_j trans[i, j] * (mask * cam)[j].
    # Computed straight into the (hg, wg) spatial layout: the reshape splits
    # only the sublane axis of trans (a layout no-op because wg % 8 == 0).
    mc = mc_ref[...].reshape(1, 1, n)                                     # (1, 1, N)
    trans3 = trans.reshape(hg, wg, n)
    cam_lo = jnp.sum(trans3 * mc, axis=-1)                                # (hg, wg)

    # scale_cam_image on cam_lo dropped: the upsample is affine-preserving
    # (U rows sum to 1) and the final _normalize is affine-invariant
    # (modulo scale_cam_image's 1e-7 eps), so the output is unchanged.

    # Bilinear upsample on the MXU, lane-dense (hg, W) intermediate first.
    tmp = jnp.dot(cam_lo, uwt_ref[...], preferred_element_type=jnp.float32)    # (hg, W)
    cam_hi = jnp.dot(uh_ref[...], tmp, preferred_element_type=jnp.float32)     # (H, W)

    # Get_CLIP_ATTN._normalize fused into one elementwise pass:
    # (x - min) / max(x - min) == (x - mn) * 1/(mx - mn).
    mn = jnp.min(cam_hi)
    mx = jnp.max(cam_hi)
    # TODO(synk): no epsilon on purpose, mirroring torch (a constant CAM would
    # produce Inf/NaN in the reference too).
    out_ref[...] = (cam_hi - mn) * (1.0 / (mx - mn))


# ------------------------------ wrapper ------------------------------------

def clip_attn_refine_cam(attn_last8, mc_row, u_h, u_wt):
    """attn_last8: (B,8,N,N) bf16, mc_row: (B,1,N) f32 (= aff_mask * cam),
    u_h: (H,hg) f32, u_wt: (wg,W) f32  ->  (B,H,W) f32 normalized CAMs."""
    B, L8, n, _ = attn_last8.shape
    H, hg = u_h.shape
    wg, W = u_wt.shape
    assert L8 == 8 and n == hg * wg
    # TODO(synk): for 224-px inputs (hg = wg = 14) the in-kernel reshape of
    # trans to (hg, wg, N) stops being a layout no-op; switch that step to an
    # MXU row-matvec (mc @ trans) + one small (1,N) relayout, or pad the grid.
    assert wg % 8 == 0, "wg must be a multiple of 8 for the layout-no-op reshape"
    # TODO(synk): for N >~ 512-700 (e.g. 448x448 images) tile the (8,N,N) stack
    # over a layer/row grid axis with an f32 accumulator and set
    # vmem_limit_bytes explicitly (v7x has only 64 MiB physical VMEM); at
    # seed-harvesting sizes everything fits comfortably.
    return pl.pallas_call(
        functools.partial(_clip_attn_cam_kernel, hg=hg, wg=wg),
        out_shape=jax.ShapeDtypeStruct((B, H, W), jnp.float32),
        grid=(B,),
        in_specs=[
            pl.BlockSpec((None, 8, n, n), lambda b: (b, 0, 0, 0)),
            pl.BlockSpec((None, 1, n), lambda b: (b, 0, 0)),
            pl.BlockSpec((H, hg), lambda b: (0, 0)),
            pl.BlockSpec((wg, W), lambda b: (0, 0)),
        ],
        out_specs=pl.BlockSpec((None, H, W), lambda b: (b, 0, 0)),
        compiler_params=pltpu.CompilerParams(dimension_semantics=("parallel",)),
    )(attn_last8, mc_row, u_h, u_wt)


# ------------------------------ glue (host) --------------------------------

def bbox_mask_from_scoremap(scoremap: np.ndarray, threshold: float = 0.4):
    """Approximation of CLIP-ES scoremap2bbox + aff_mask fill (glue, not kernel).

    TODO(synk): original uses cv2.findContours multi-contour bbox evaluation;
    here a single bounding box over the thresholded region is used.
    """
    sm = scoremap.astype(np.float64)
    sm = (sm - sm.min()) / (sm.max() - sm.min() + 1e-12)
    binary = sm >= threshold
    mask = np.zeros_like(sm, dtype=np.float32)
    ys, xs = np.where(binary)
    if ys.size > 0:
        mask[ys.min():ys.max() + 1, xs.min():xs.max() + 1] = 1.0
    return mask


def bilinear_resize_matrix(dst_size: int, src_size: int) -> np.ndarray:
    """(dst, src) bilinear interpolation matrix, cv2.INTER_LINEAR half-pixel
    convention with edge clamping (rows sum to 1).

    TODO(synk): cv2 uses fixed-point interpolation weights internally; this
    float version matches to ~1e-5, not bit-exactly.
    """
    m = np.zeros((dst_size, src_size), dtype=np.float32)
    if src_size == 1:
        m[:, 0] = 1.0
        return m
    scale = src_size / dst_size
    for d in range(dst_size):
        s = (d + 0.5) * scale - 0.5
        s0 = int(np.floor(s))
        t = s - s0
        i0 = min(max(s0, 0), src_size - 1)
        i1 = min(max(s0 + 1, 0), src_size - 1)
        m[d, i0] += 1.0 - t
        m[d, i1] += t
    return m


if __name__ == "__main__":
    key = jax.random.PRNGKey(0)

    # Small shapes consistent with the module: ViT-B/16 patch grid, batch 1.
    B, C, H, W = 1, 3, 128, 128       # NCHW image
    hg, wg = H // 16, W // 16         # 8 x 8 patch grid
    N = hg * wg                       # 64 spatial tokens (CLS excluded)
    S = N + 1                         # 65 tokens including CLS
    L = 10                            # synthetic number of transformer layers

    k_x, k_attn, k_cam = jax.random.split(key, 3)

    # Input image (drives h/w only; CLIP encode_image is synthesized).
    x = jax.random.normal(k_x, (B, C, H, W), dtype=jnp.float32)

    # TODO(synk): CLIP ViT-B/16 encode_image + GradCAM backprop are not a Pallas
    # kernel workload; their outputs (attn weights, grayscale_cam) are synthesized.
    attn_logits = jax.random.normal(k_attn, (L, B, S, S), dtype=jnp.float32)
    attn_weight_list = jax.nn.softmax(attn_logits, axis=-1)
    grayscale_cam = jax.random.uniform(k_cam, (hg, wg), dtype=jnp.float32)

    # Glue: `[aw[:, 1:, 1:] for aw in attn_weight_list]`, stack, [-8:], batch 0.
    # bf16 feed halves the dominant DMA; accumulation / Sinkhorn stay f32 in-kernel.
    attn_last8 = attn_weight_list[-8:, 0, 1:, 1:].astype(jnp.bfloat16)    # (8, N, N)
    attn_last8 = attn_last8[None]                                         # (B, 8, N, N)

    # Glue: aff_mask from bbox of thresholded scoremap; fold mask * cam on host
    # into a single lane-dense (B, 1, N) row.
    aff_mask_2d = bbox_mask_from_scoremap(np.asarray(grayscale_cam), 0.4)
    mc_row = (jnp.asarray(aff_mask_2d, dtype=jnp.float32) * grayscale_cam)
    mc_row = mc_row.reshape(1, 1, N).astype(jnp.float32)                  # (B, 1, N)

    # Bilinear upsample operators for the in-kernel MXU resize.
    u_h = jnp.asarray(bilinear_resize_matrix(H, hg))                      # (H, hg)
    u_wt = jnp.asarray(bilinear_resize_matrix(W, wg).T)                   # (wg, W)

    # Single fused Pallas launch: refine + resize + normalize (batched grid).
    out_cam = clip_attn_refine_cam(attn_last8, mc_row, u_h, u_wt)
    out_cam = jax.block_until_ready(out_cam)

    assert out_cam.shape == (B, H, W)
    assert bool(jnp.isfinite(out_cam).all())
    assert float(out_cam.min()) >= -1e-5 and float(out_cam.max()) <= 1.0 + 1e-5
    print("KERNEL_OK")
</pallas_src>

<mosaic_0001>
module attributes {stable_mosaic.version = 11 : i64} {
  func.func @_clip_attn_cam_kernel(%arg0: i32, %arg1: memref<1x8x64x64xbf16, #tpu.memory_space<vmem>>, %arg2: memref<1x1x64xf32, #tpu.memory_space<vmem>>, %arg3: memref<128x8xf32, #tpu.memory_space<vmem>>, %arg4: memref<8x128xf32, #tpu.memory_space<vmem>>, %arg5: memref<1x128x128xf32, #tpu.memory_space<vmem>>) attributes {dimension_semantics = [#tpu.dimension_semantics<parallel>], iteration_bounds = array<i64: 1>, scalar_prefetch = 0 : i64, scratch_operands = 0 : i64, tpu.core_type = #tpu.core_type<tc>, window_params = [{transform_indices = @transform_0, window_bounds = array<i64: 1, 8, 64, 64>}, {transform_indices = @transform_1, window_bounds = array<i64: 1, 1, 64>}, {pipeline_mode = #tpu.pipeline_mode<synchronous>, transform_indices = @transform_2, window_bounds = array<i64: 128, 8>}, {pipeline_mode = #tpu.pipeline_mode<synchronous>, transform_indices = @transform_3, window_bounds = array<i64: 8, 128>}, {transform_indices = @transform_4, window_bounds = array<i64: 1, 128, 128>}]} {
    %cst = arith.constant 0.000000e+00 : f32
    %0 = vector.broadcast %cst : f32 to vector<64x64xf32>
    %c0_i32 = arith.constant 0 : i32
    %c0 = arith.constant 0 : index
    %1 = arith.index_cast %c0_i32 : i32 to index
    %c0_0 = arith.constant 0 : index
    %c0_1 = arith.constant 0 : index
    %2 = vector.load %arg1[%c0, %1, %c0_0, %c0_1] : memref<1x8x64x64xbf16, #tpu.memory_space<vmem>>, vector<1x1x64x64xbf16>
    %3 = vector.shape_cast %2 : vector<1x1x64x64xbf16> to vector<64x64xbf16>
    %4 = arith.extf %3 : vector<64x64xbf16> to vector<64x64xf32>
    %5 = arith.addf %0, %4 : vector<64x64xf32>
    %c1_i32 = arith.constant 1 : i32
    %c0_2 = arith.constant 0 : index
    %6 = arith.index_cast %c1_i32 : i32 to index
    %c0_3 = arith.constant 0 : index
    %c0_4 = arith.constant 0 : index
    %7 = vector.load %arg1[%c0_2, %6, %c0_3, %c0_4] : memref<1x8x64x64xbf16, #tpu.memory_space<vmem>>, vector<1x1x64x64xbf16>
    %8 = vector.shape_cast %7 : vector<1x1x64x64xbf16> to vector<64x64xbf16>
    %9 = arith.extf %8 : vector<64x64xbf16> to vector<64x64xf32>
    %10 = arith.addf %5, %9 : vector<64x64xf32>
    %c2_i32 = arith.constant 2 : i32
    %c0_5 = arith.constant 0 : index
    %11 = arith.index_cast %c2_i32 : i32 to index
    %c0_6 = arith.constant 0 : index
    %c0_7 = arith.constant 0 : index
    %12 = vector.load %arg1[%c0_5, %11, %c0_6, %c0_7] : memref<1x8x64x64xbf16, #tpu.memory_space<vmem>>, vector<1x1x64x64xbf16>
    %13 = vector.shape_cast %12 : vector<1x1x64x64xbf16> to vector<64x64xbf16>
    %14 = arith.extf %13 : vector<64x64xbf16> to vector<64x64xf32>
    %15 = arith.addf %10, %14 : vector<64x64xf32>
    %c3_i32 = arith.constant 3 : i32
    %c0_8 = arith.constant 0 : index
    %16 = arith.index_cast %c3_i32 : i32 to index
    %c0_9 = arith.constant 0 : index
    %c0_10 = arith.constant 0 : index
    %17 = vector.load %arg1[%c0_8, %16, %c0_9, %c0_10] : memref<1x8x64x64xbf16, #tpu.memory_space<vmem>>, vector<1x1x64x64xbf16>
    %18 = vector.shape_cast %17 : vector<1x1x64x64xbf16> to vector<64x64xbf16>
    %19 = arith.extf %18 : vector<64x64xbf16> to vector<64x64xf32>
    %20 = arith.addf %15, %19 : vector<64x64xf32>
    %c4_i32 = arith.constant 4 : i32
    %c0_11 = arith.constant 0 : index
    %21 = arith.index_cast %c4_i32 : i32 to index
    %c0_12 = arith.constant 0 : index
    %c0_13 = arith.constant 0 : index
    %22 = vector.load %arg1[%c0_11, %21, %c0_12, %c0_13] : memref<1x8x64x64xbf16, #tpu.memory_space<vmem>>, vector<1x1x64x64xbf16>
    %23 = vector.shape_cast %22 : vector<1x1x64x64xbf16> to vector<64x64xbf16>
    %24 = arith.extf %23 : vector<64x64xbf16> to vector<64x64xf32>
    %25 = arith.addf %20, %24 : vector<64x64xf32>
    %c5_i32 = arith.constant 5 : i32
    %c0_14 = arith.constant 0 : index
    %26 = arith.index_cast %c5_i32 : i32 to index
    %c0_15 = arith.constant 0 : index
    %c0_16 = arith.constant 0 : index
    %27 = vector.load %arg1[%c0_14, %26, %c0_15, %c0_16] : memref<1x8x64x64xbf16, #tpu.memory_space<vmem>>, vector<1x1x64x64xbf16>
    %28 = vector.shape_cast %27 : vector<1x1x64x64xbf16> to vector<64x64xbf16>
    %29 = arith.extf %28 : vector<64x64xbf16> to vector<64x64xf32>
    %30 = arith.addf %25, %29 : vector<64x64xf32>
    %c6_i32 = arith.constant 6 : i32
    %c0_17 = arith.constant 0 : index
    %31 = arith.index_cast %c6_i32 : i32 to index
    %c0_18 = arith.constant 0 : index
    %c0_19 = arith.constant 0 : index
    %32 = vector.load %arg1[%c0_17, %31, %c0_18, %c0_19] : memref<1x8x64x64xbf16, #tpu.memory_space<vmem>>, vector<1x1x64x64xbf16>
    %33 = vector.shape_cast %32 : vector<1x1x64x64xbf16> to vector<64x64xbf16>
    %34 = arith.extf %33 : vector<64x64xbf16> to vector<64x64xf32>
    %35 = arith.addf %30, %34 : vector<64x64xf32>
    %c7_i32 = arith.constant 7 : i32
    %c0_20 = arith.constant 0 : index
    %36 = arith.index_cast %c7_i32 : i32 to index
    %c0_21 = arith.constant 0 : index
    %c0_22 = arith.constant 0 : index
    %37 = vector.load %arg1[%c0_20, %36, %c0_21, %c0_22] : memref<1x8x64x64xbf16, #tpu.memory_space<vmem>>, vector<1x1x64x64xbf16>
    %38 = vector.shape_cast %37 : vector<1x1x64x64xbf16> to vector<64x64xbf16>
    %39 = arith.extf %38 : vector<64x64xbf16> to vector<64x64xf32>
    %40 = arith.addf %35, %39 : vector<64x64xf32>
    %c8_i32 = arith.constant 8 : i32
    %cst_23 = arith.constant dense<0.000000e+00> : vector<64xf32>
    %41 = vector.multi_reduction <add>, %40, %cst_23 [0] : vector<64x64xf32> to vector<64xf32>
    %42 = vector.shape_cast %41 : vector<64xf32> to vector<1x64xf32>
    %43 = tpu.reciprocal %42 {approx = true} : vector<1x64xf32> -> vector<1x64xf32>
    %44 = vector.broadcast %43 : vector<1x64xf32> to vector<64x64xf32>
    %45 = arith.mulf %40, %44 : vector<64x64xf32>
    %cst_24 = arith.constant dense<0.000000e+00> : vector<64xf32>
    %46 = vector.multi_reduction <add>, %45, %cst_24 [1] : vector<64x64xf32> to vector<64xf32>
    %47 = vector.shape_cast %46 : vector<64xf32> to vector<64x1xf32>
    %48 = tpu.reciprocal %47 {approx = true} : vector<64x1xf32> -> vector<64x1xf32>
    %49 = vector.broadcast %48 : vector<64x1xf32> to vector<64x64xf32>
    %50 = arith.mulf %45, %49 : vector<64x64xf32>
    %cst_25 = arith.constant dense<0.000000e+00> : vector<64xf32>
    %51 = vector.multi_reduction <add>, %50, %cst_25 [0] : vector<64x64xf32> to vector<64xf32>
    %52 = vector.shape_cast %51 : vector<64xf32> to vector<1x64xf32>
    %53 = tpu.reciprocal %52 {approx = true} : vector<1x64xf32> -> vector<1x64xf32>
    %54 = vector.broadcast %53 : vector<1x64xf32> to vector<64x64xf32>
    %55 = arith.mulf %50, %54 : vector<64x64xf32>
    %cst_26 = arith.constant dense<0.000000e+00> : vector<64xf32>
    %56 = vector.multi_reduction <add>, %55, %cst_26 [1] : vector<64x64xf32> to vector<64xf32>
    %57 = vector.shape_cast %56 : vector<64xf32> to vector<64x1xf32>
    %58 = tpu.reciprocal %57 {approx = true} : vector<64x1xf32> -> vector<64x1xf32>
    %59 = vector.broadcast %58 : vector<64x1xf32> to vector<64x64xf32>
    %60 = arith.mulf %55, %59 : vector<64x64xf32>
    %cst_27 = arith.constant dense<0.000000e+00> : vector<64xf32>
    %61 = vector.multi_reduction <add>, %60, %cst_27 [0] : vector<64x64xf32> to vector<64xf32>
    %62 = vector.shape_cast %61 : vector<64xf32> to vector<1x64xf32>
    %63 = tpu.reciprocal %62 {approx = true} : vector<1x64xf32> -> vector<1x64xf32>
    %64 = vector.broadcast %63 : vector<1x64xf32> to vector<64x64xf32>
    %65 = arith.mulf %60, %64 : vector<64x64xf32>
    %cst_28 = arith.constant dense<0.000000e+00> : vector<64xf32>
    %66 = vector.multi_reduction <add>, %65, %cst_28 [1] : vector<64x64xf32> to vector<64xf32>
    %67 = vector.shape_cast %66 : vector<64xf32> to vector<64x1xf32>
    %68 = tpu.reciprocal %67 {approx = true} : vector<64x1xf32> -> vector<64x1xf32>
    %69 = vector.broadcast %68 : vector<64x1xf32> to vector<64x64xf32>
    %70 = arith.mulf %65, %69 : vector<64x64xf32>
    %71 = tpu.transpose %70, [1, 0] : vector<64x64xf32> -> vector<64x64xf32>
    %72 = arith.addf %70, %71 : vector<64x64xf32>
    %cst_29 = arith.constant dense<0.000000e+00> : vector<64x64xf32>
    %73 = tpu.matmul %72, %72, %cst_29 {dimension_numbers = #tpu.dot_dimension_numbers<[1], [0], [0], [1], [0, 0, 1, 1], [], []>} : vector<64x64xf32>, vector<64x64xf32>, vector<64x64xf32> -> vector<64x64xf32>
    %c0_30 = arith.constant 0 : index
    %c0_31 = arith.constant 0 : index
    %c0_32 = arith.constant 0 : index
    %74 = vector.load %arg2[%c0_30, %c0_31, %c0_32] : memref<1x1x64xf32, #tpu.memory_space<vmem>>, vector<1x1x64xf32>
    %75 = vector.shape_cast %74 : vector<1x1x64xf32> to vector<1x64xf32>
    %76 = vector.shape_cast %75 : vector<1x64xf32> to vector<1x1x64xf32>
    %77 = vector.shape_cast %73 : vector<64x64xf32> to vector<8x8x64xf32>
    %78 = vector.broadcast %76 : vector<1x1x64xf32> to vector<8x8x64xf32>
    %79 = arith.mulf %77, %78 : vector<8x8x64xf32>
    %cst_33 = arith.constant dense<0.000000e+00> : vector<8x8xf32>
    %80 = vector.multi_reduction <add>, %79, %cst_33 [2] : vector<8x8x64xf32> to vector<8x8xf32>
    %c0_34 = arith.constant 0 : index
    %c0_35 = arith.constant 0 : index
    %81 = vector.load %arg4[%c0_34, %c0_35] : memref<8x128xf32, #tpu.memory_space<vmem>>, vector<8x128xf32>
    %cst_36 = arith.constant dense<0.000000e+00> : vector<8x128xf32>
    %82 = tpu.matmul %80, %81, %cst_36 {dimension_numbers = #tpu.dot_dimension_numbers<[1], [0], [0], [1], [0, 0, 1, 1], [], []>} : vector<8x8xf32>, vector<8x128xf32>, vector<8x128xf32> -> vector<8x128xf32>
    %c0_37 = arith.constant 0 : index
    %c0_38 = arith.constant 0 : index
    %83 = vector.load %arg3[%c0_37, %c0_38] : memref<128x8xf32, #tpu.memory_space<vmem>>, vector<128x8xf32>
    %cst_39 = arith.constant dense<0.000000e+00> : vector<128x128xf32>
    %84 = tpu.matmul %83, %82, %cst_39 {dimension_numbers = #tpu.dot_dimension_numbers<[1], [0], [0], [1], [0, 0, 1, 1], [], []>} : vector<128x8xf32>, vector<8x128xf32>, vector<128x128xf32> -> vector<128x128xf32>
    %85 = vector.shape_cast %84 : vector<128x128xf32> to vector<1x128x128xf32>
    %cst_40 = arith.constant dense<0x7F800000> : vector<1xf32>
    %86 = vector.multi_reduction <minimumf>, %85, %cst_40 [1, 2] : vector<1x128x128xf32> to vector<1xf32>
    %87 = vector.shape_cast %86 : vector<1xf32> to vector<1x1x1xf32>
    %88 = vector.extract %87[0, 0, 0] : f32 from vector<1x1x1xf32>
    %89 = vector.shape_cast %84 : vector<128x128xf32> to vector<1x128x128xf32>
    %cst_41 = arith.constant dense<0xFF800000> : vector<1xf32>
    %90 = vector.multi_reduction <maximumf>, %89, %cst_41 [1, 2] : vector<1x128x128xf32> to vector<1xf32>
    %91 = vector.shape_cast %90 : vector<1xf32> to vector<1x1x1xf32>
    %92 = vector.extract %91[0, 0, 0] : f32 from vector<1x1x1xf32>
    %93 = vector.broadcast %88 : f32 to vector<128x128xf32>
    %94 = arith.subf %84, %93 : vector<128x128xf32>
    %95 = arith.subf %92, %88 : f32
    %cst_42 = arith.constant 1.000000e+00 : f32
    %96 = arith.divf %cst_42, %95 : f32
    %97 = vector.broadcast %96 : f32 to vector<128x128xf32>
    %98 = arith.mulf %94, %97 : vector<128x128xf32>
    %c0_43 = arith.constant 0 : index
    %c0_44 = arith.constant 0 : index
    %c0_45 = arith.constant 0 : index
    %99 = vector.load %arg5[%c0_43, %c0_44, %c0_45] : memref<1x128x128xf32, #tpu.memory_space<vmem>>, vector<1x128x128xf32>
    %100 = vector.shape_cast %99 : vector<1x128x128xf32> to vector<128x128xf32>
    %101 = vector.shape_cast %98 : vector<128x128xf32> to vector<1x128x128xf32>
    tpu.vector_store %arg5[%c0_43, %c0_44, %c0_45], %101 {strides = array<i32>} : memref<1x128x128xf32, #tpu.memory_space<vmem>>, vector<1x128x128xf32>,
    return
  }
  func.func @transform_0(%arg0: i32) -> (i32, i32, i32, i32) {
    %c0_i32 = arith.constant 0 : i32
    %c0_i32_0 = arith.constant 0 : i32
    %c0_i32_1 = arith.constant 0 : i32
    %c0_i32_2 = arith.constant 0 : i32
    return %arg0, %c0_i32, %c0_i32_0, %c0_i32_1 : i32, i32, i32, i32
  }
  func.func @transform_1(%arg0: i32) -> (i32, i32, i32) {
    %c0_i32 = arith.constant 0 : i32
    %c0_i32_0 = arith.constant 0 : i32
    %c0_i32_1 = arith.constant 0 : i32
    return %arg0, %c0_i32, %c0_i32_0 : i32, i32, i32
  }
  func.func @transform_2(%arg0: i32) -> (i32, i32) {
    %c0_i32 = arith.constant 0 : i32
    %c0_i32_0 = arith.constant 0 : i32
    %c0_i32_1 = arith.constant 0 : i32
    return %c0_i32, %c0_i32_0 : i32, i32
  }
  func.func @transform_3(%arg0: i32) -> (i32, i32) {
    %c0_i32 = arith.constant 0 : i32
    %c0_i32_0 = arith.constant 0 : i32
    %c0_i32_1 = arith.constant 0 : i32
    return %c0_i32, %c0_i32_0 : i32, i32
  }
  func.func @transform_4(%arg0: i32) -> (i32, i32, i32) {
    %c0_i32 = arith.constant 0 : i32
    %c0_i32_0 = arith.constant 0 : i32
    %c0_i32_1 = arith.constant 0 : i32
    return %arg0, %c0_i32, %c0_i32_0 : i32, i32, i32
  }
}

</mosaic_0001>

<bundles_post_ra>
// kernel: tpu_custom_call.1
= control target key start
LH: loop header
LB: loop body
LE: loop exit
PB: predicated region body
PF: predicated region fallthrough
CT: control target
= control target key end

     0   :  { %9 = vsyncpa [#allocation3], 0  ;;  %s1755_s0 = inlined_call_operand.hbm [shape: bf16[1,8,64,64], index: 0, kind: input, shape index: {}]   ;;  %s1756_s1 = inlined_call_operand.vmem [shape: f32[1,1,64], index: 1, kind: input, shape index: {}]   ;;  %s1757_s2 = inlined_call_operand.vmem [shape: f32[128,8], index: 2, kind: input, shape index: {}]   ;;  %s1758_s3 = inlined_call_operand.vmem [shape: f32[8,128], index: 3, kind: input, shape index: {}]   ;;  %s1759_s4 = inlined_call_operand.hbm [shape: f32[1,128,128], index: 4, kind: output, shape index: {}]  }
   0x1   :  { %10 = vsyncpa [#allocation4], 0  ;;  %s1494_s15 = smov [#allocation2]  }
   0x2   :  { %s16_s16 = sshll.u32 %s1494_s15, 4  ;;  %s17_s16 = int_to_ptr.vmem [resolvable:$true] %s16_s16 }
   0x3   :  { %s1458_s17 = scalar_lea.vmem %s17_s16, 4096  ;;  %p1463_p1 = scmp.lt.s32.totalorder %s17_s16, %s17_s16 }
   0x4   :  { %p1459_p0 = scmp.ne.s32.totalorder %s17_s16, %s1458_s17  ;;  %p1464_p2 = scmp.lt.s32.totalorder %s1458_s17, %s1458_s17 }
   0x6   :  { %p1465_p3 = por %p1464_p2, %p1463_p1 }
   0x8   :  { %p1466_p4 = pnand %p1465_p3, %p1459_p0 }
   0xa   :  { %1469 = shalt.err (!%p1466_p4)
}
   0xb   :  { %s1495_s18 = smov 64   ;;  %s1496_s19 = smov 4  }
   0xc   :  { %22 = dma.hbm_to_vmem [thread:$0]  %s1755_s0, 4096, %s17_s16, [#allocation3], %s1495_s18, %s1495_s18, %s1496_s19  }
   0xd   :  { %1490 = dma.done.wait [#allocation3], 4096  }
   0xe   :  { %1491 = vsyncadd [#allocation3], 4294963200  ;;  %v1135_v0 = vld [vmem:[#allocation2] sm:$0xff]   ;;  %v1262_v1 = vld [vmem:[#allocation2 + $0x8] sm:$0xff]   ;;  %vm231_vm0 = vcmask 523264   ;;  %vm1498_vm1 = vmmov 0  }
   0xf   :  { %v1263_v2 = vld [vmem:[#allocation2 + $0x10] sm:$0xff]   ;;  %v1136_v3 = vunpack.c.l.bf16 %v1135_v0  ;;  %v1137_v4 = vunpack.c.h.bf16 %v1135_v0  ;;  %v1140_v5 = vunpack.c.l.bf16 %v1262_v1  ;;  %v1141_v6 = vunpack.c.h.bf16 %v1262_v1  ;;  %v1264_v7 = vld [vmem:[#allocation2 + $0x18] sm:$0xff]   ;;  %v1151_v8 = vld [vmem:[#allocation2 + $0x20] sm:$0xff]   ;;  %s1499_s29 = smov [#allocation5]  }
  0x10   :  { %v1265_v9 = vld [vmem:[#allocation2 + $0x28] sm:$0xff]   ;;  %v1144_v10 = vunpack.c.l.bf16 %v1263_v2  ;;  %v1145_v11 = vunpack.c.h.bf16 %v1263_v2  ;;  %v1266_v12 = vld [vmem:[#allocation2 + $0x30] sm:$0xff]   ;;  %v1267_v13 = vld [vmem:[#allocation2 + $0x38] sm:$0xff]   ;;  %v1152_v14 = vunpack.c.l.bf16 %v1151_v8  ;;  %v1153_v15 = vunpack.c.h.bf16 %v1151_v8  ;;  %s1096_s30 = sshll.u32 %s1499_s29, 4  ;;  %s1745_s30 = int_to_ptr.vmem [resolvable:$true] %s1096_s30 }
  0x11   :  { %v1156_v16 = vunpack.c.l.bf16 %v1265_v9  ;;  %v1157_v17 = vunpack.c.h.bf16 %v1265_v9  ;;  %v1148_v18 = vunpack.c.l.bf16 %v1264_v7  ;;  %v1160_v19 = vunpack.c.l.bf16 %v1266_v12  ;;  %v1167_v22 = vld [vmem:[#allocation2 + $0x40] sm:$0xff]   ;;  %v1268_v23 = vld [vmem:[#allocation2 + $0x48] sm:$0xff]   ;;  %v1269_v28 = vld [vmem:[#allocation2 + $0x50] sm:$0xff]   ;;  %s1470_s5 = scalar_lea.vmem %s1745_s30, 2048  ;;  %p1475_p6 = scmp.lt.s32.totalorder %s1745_s30, %s1745_s30 }
  0x12   :  { %v1161_v20 = vunpack.c.h.bf16 %v1266_v12  ;;  %v1164_v21 = vunpack.c.l.bf16 %v1267_v13  ;;  %v73_v24 = vadd.f32 %v1152_v14, %v1136_v3  ;;  %v74_v25 = vadd.f32 %v1153_v15, %v1137_v4  ;;  %v1270_v29 = vld [vmem:[#allocation2 + $0x58] sm:$0xff]   ;;  %v1183_v42 = vld [vmem:[#allocation2 + $0x60] sm:$0xff]   ;;  %v1271_v43 = vld [vmem:[#allocation2 + $0x68] sm:$0xff]   ;;  %p1471_p5 = scmp.ne.s32.totalorder %s1745_s30, %s1470_s5  ;;  %p1476_p7 = scmp.lt.s32.totalorder %s1470_s5, %s1470_s5 }
  0x13   :  { %v75_v26 = vadd.f32 %v1156_v16, %v1140_v5  ;;  %v76_v27 = vadd.f32 %v1157_v17, %v1141_v6  ;;  %v1149_v30 = vunpack.c.h.bf16 %v1264_v7  ;;  %v1165_v31 = vunpack.c.h.bf16 %v1267_v13  ;;  %v1272_v48 = vld [vmem:[#allocation2 + $0x70] sm:$0xff]   ;;  %v1273_v49 = vld [vmem:[#allocation2 + $0x78] sm:$0xff]   ;;  %v1199_v62 = vld [vmem:[#allocation2 + $0x80] sm:$0xff]  }
  0x14   :  { %v77_v32 = vadd.f32 %v1160_v19, %v1144_v10  ;;  %v78_v33 = vadd.f32 %v1161_v20, %v1145_v11  ;;  %v1168_v34 = vunpack.c.l.bf16 %v1167_v22  ;;  %v1169_v35 = vunpack.c.h.bf16 %v1167_v22  ;;  %v1274_v63 = vld [vmem:[#allocation2 + $0x88] sm:$0xff]   ;;  %v1275_v4 = vld [vmem:[#allocation2 + $0x90] sm:$0xff]   ;;  %v1276_v5 = vld [vmem:[#allocation2 + $0x98] sm:$0xff]   ;;  %p1477_p8 = por %p1476_p7, %p1475_p6 }
  0x15   :  { %v1172_v36 = vunpack.c.l.bf16 %v1268_v23  ;;  %v1173_v37 = vunpack.c.h.bf16 %v1268_v23  ;;  %v79_v38 = vadd.f32 %v1164_v21, %v1148_v18  ;;  %v1176_v39 = vunpack.c.l.bf16 %v1269_v28  ;;  %v1215_v18 = vld [vmem:[#allocation2 + $0xa0] sm:$0xff]   ;;  %v1277_v19 = vld [vmem:[#allocation2 + $0xa8] sm:$0xff]  }
  0x16   :  { %v1177_v40 = vunpack.c.h.bf16 %v1269_v28  ;;  %v1180_v41 = vunpack.c.l.bf16 %v1270_v29  ;;  %v98_v44 = vadd.f32 %v1168_v34, %v73_v24  ;;  %v99_v45 = vadd.f32 %v1169_v35, %v74_v25  ;;  %v1278_v24 = vld [vmem:[#allocation2 + $0xb0] sm:$0xff]   ;;  %p1478_p9 = pnand %p1477_p8, %p1471_p5 }
  0x17   :  { %v100_v46 = vadd.f32 %v1172_v36, %v75_v26  ;;  %v101_v47 = vadd.f32 %v1173_v37, %v76_v27  ;;  %v80_v50 = vadd.f32 %v1165_v31, %v1149_v30  ;;  %v1181_v51 = vunpack.c.h.bf16 %v1270_v29  ;;  %v1231_v37 = vld [vmem:[#allocation2 + $0xc0] sm:$0xff]  }
  0x18   :  { %v102_v52 = vadd.f32 %v1176_v39, %v77_v32  ;;  %v103_v53 = vadd.f32 %v1177_v40, %v78_v33  ;;  %v1184_v54 = vunpack.c.l.bf16 %v1183_v42  ;;  %v1185_v55 = vunpack.c.h.bf16 %v1183_v42  ;;  %v1279_v32 = vld [vmem:[#allocation2 + $0xb8] sm:$0xff]  }
  0x19   :  { %v1188_v56 = vunpack.c.l.bf16 %v1271_v43  ;;  %v1189_v57 = vunpack.c.h.bf16 %v1271_v43  ;;  %v104_v58 = vadd.f32 %v1180_v41, %v79_v38  ;;  %v1192_v59 = vunpack.c.l.bf16 %v1272_v48  ;;  %v1280_v38 = vld [vmem:[#allocation2 + $0xc8] sm:$0xff]   ;;  %v1281_v43 = vld [vmem:[#allocation2 + $0xd0] sm:$0xff]  }
  0x1a   :  { %v1193_v60 = vunpack.c.h.bf16 %v1272_v48  ;;  %v1196_v61 = vunpack.c.l.bf16 %v1273_v49  ;;  %v123_v0 = vadd.f32 %v1184_v54, %v98_v44  ;;  %v124_v1 = vadd.f32 %v1185_v55, %v99_v45 }
  0x1b   :  { %v125_v2 = vadd.f32 %v1188_v56, %v100_v46  ;;  %v126_v3 = vadd.f32 %v1189_v57, %v101_v47  ;;  %v105_v6 = vadd.f32 %v1181_v51, %v80_v50  ;;  %v1197_v7 = vunpack.c.h.bf16 %v1273_v49  ;;  %v1247_v56 = vld [vmem:[#allocation2 + $0xe0] sm:$0xff]   ;;  %v1283_v57 = vld [vmem:[#allocation2 + $0xe8] sm:$0xff]  }
  0x1c   :  { %v127_v8 = vadd.f32 %v1192_v59, %v102_v52  ;;  %v128_v9 = vadd.f32 %v1193_v60, %v103_v53  ;;  %v1200_v10 = vunpack.c.l.bf16 %v1199_v62  ;;  %v1201_v11 = vunpack.c.h.bf16 %v1199_v62  ;;  %v1282_v52 = vld [vmem:[#allocation2 + $0xd8] sm:$0xff]   ;;  %v1284_v62 = vld [vmem:[#allocation2 + $0xf0] sm:$0xff]  }
  0x1d   :  { %v1204_v12 = vunpack.c.l.bf16 %v1274_v63  ;;  %v1205_v13 = vunpack.c.h.bf16 %v1274_v63  ;;  %v129_v14 = vadd.f32 %v1196_v61, %v104_v58  ;;  %v1208_v15 = vunpack.c.l.bf16 %v1275_v4 }
  0x1e   :  { %v1209_v16 = vunpack.c.h.bf16 %v1275_v4  ;;  %v1212_v17 = vunpack.c.l.bf16 %v1276_v5  ;;  %v148_v20 = vadd.f32 %v1200_v10, %v123_v0  ;;  %v149_v21 = vadd.f32 %v1201_v11, %v124_v1 }
  0x1f   :  { %v150_v22 = vadd.f32 %v1204_v12, %v125_v2  ;;  %v151_v23 = vadd.f32 %v1205_v13, %v126_v3  ;;  %v130_v25 = vadd.f32 %v1197_v7, %v105_v6  ;;  %v1213_v26 = vunpack.c.h.bf16 %v1276_v5  ;;  %v1285_v7 = vld [vmem:[#allocation2 + $0xf8] sm:$0xff]  }
  0x20   :  { %v152_v27 = vadd.f32 %v1208_v15, %v127_v8  ;;  %v1216_v28 = vunpack.c.l.bf16 %v1215_v18  ;;  %v1217_v29 = vunpack.c.h.bf16 %v1215_v18  ;;  %v1220_v30 = vunpack.c.l.bf16 %v1277_v19 }
  0x21   :  { %v1221_v31 = vunpack.c.h.bf16 %v1277_v19  ;;  %v153_v33 = vadd.f32 %v1209_v16, %v128_v9  ;;  %v154_v34 = vadd.f32 %v1212_v17, %v129_v14  ;;  %v1224_v35 = vunpack.c.l.bf16 %v1278_v24 }
  0x22   :  { %v1225_v36 = vunpack.c.h.bf16 %v1278_v24  ;;  %v173_v39 = vadd.f32 %v1216_v28, %v148_v20  ;;  %v174_v40 = vadd.f32 %v1217_v29, %v149_v21  ;;  %v175_v41 = vadd.f32 %v1220_v30, %v150_v22 }
  0x23   :  { %v176_v42 = vadd.f32 %v1221_v31, %v151_v23  ;;  %v155_v44 = vadd.f32 %v1213_v26, %v130_v25  ;;  %v1228_v45 = vunpack.c.l.bf16 %v1279_v32  ;;  %v1229_v46 = vunpack.c.h.bf16 %v1279_v32 }
  0x24   :  { %v177_v47 = vadd.f32 %v1224_v35, %v152_v27  ;;  %v1232_v48 = vunpack.c.l.bf16 %v1231_v37  ;;  %v1233_v49 = vunpack.c.h.bf16 %v1231_v37  ;;  %v1236_v50 = vunpack.c.l.bf16 %v1280_v38 }
  0x25   :  { %v1237_v51 = vunpack.c.h.bf16 %v1280_v38  ;;  %v178_v53 = vadd.f32 %v1225_v36, %v153_v33  ;;  %v1240_v54 = vunpack.c.l.bf16 %v1281_v43  ;;  %v1241_v55 = vunpack.c.h.bf16 %v1281_v43 }
  0x26   :  { %v198_v58 = vadd.f32 %v1232_v48, %v173_v39  ;;  %v199_v59 = vadd.f32 %v1233_v49, %v174_v40  ;;  %v200_v60 = vadd.f32 %v1236_v50, %v175_v41  ;;  %v179_v63 = vadd.f32 %v1228_v45, %v154_v34 }
  0x27   :  { %v201_v61 = vadd.f32 %v1237_v51, %v176_v42  ;;  %v180_v0 = vadd.f32 %v1229_v46, %v155_v44  ;;  %v1244_v1 = vunpack.c.l.bf16 %v1282_v52  ;;  %v202_v2 = vadd.f32 %v1240_v54, %v177_v47 }
  0x28   :  { %v1248_v3 = vunpack.c.l.bf16 %v1247_v56  ;;  %v1249_v4 = vunpack.c.h.bf16 %v1247_v56  ;;  %v1252_v5 = vunpack.c.l.bf16 %v1283_v57  ;;  %v1253_v6 = vunpack.c.h.bf16 %v1283_v57 }
  0x29   :  { %v1245_v8 = vunpack.c.h.bf16 %v1282_v52  ;;  %v203_v9 = vadd.f32 %v1241_v55, %v178_v53  ;;  %v1256_v10 = vunpack.c.l.bf16 %v1284_v62  ;;  %v1257_v11 = vunpack.c.h.bf16 %v1284_v62 }
  0x2a   :  { %v223_v12 = vadd.f32 %v1248_v3, %v198_v58  ;;  %v224_v13 = vadd.f32 %v1249_v4, %v199_v59  ;;  %v225_v14 = vadd.f32 %v1252_v5, %v200_v60  ;;  %v226_v15 = vadd.f32 %v1253_v6, %v201_v61 }
  0x2b   :  { %v204_v16 = vadd.f32 %v1244_v1, %v179_v63  ;;  %v1260_v17 = vunpack.c.l.bf16 %v1285_v7  ;;  %v227_v18 = vadd.f32 %v1256_v10, %v202_v2  ;;  %v205_v23 = vadd.f32 %v1245_v8, %v180_v0 }
  0x2c   :  { %v232_v19 = vsel %vm231_vm0, %v223_v12, 0.0  ;;  %v233_v20 = vsel %vm231_vm0, %v224_v13, 0.0  ;;  %v235_v21 = vsel %vm231_vm0, %v225_v14, 0.0  ;;  %v1261_v24 = vunpack.c.h.bf16 %v1285_v7 }
  0x2d   :  { %v234_v22 = vadd.f32 %v233_v20, %v232_v19  ;;  %v228_v25 = vadd.f32 %v1257_v11, %v203_v9  ;;  %v237_v26 = vsel %vm231_vm0, %v226_v15, 0.0  ;;  %v229_v28 = vadd.f32 %v1260_v17, %v204_v16 }
  0x2e   :  { %v239_v29 = vsel %vm231_vm0, %v227_v18, 0.0  ;;  %v230_v31 = vadd.f32 %v1261_v24, %v205_v23  ;;  %vm693_vm2 = vcmask 1041409   ;;  %vm695_vm3 = vcmask 1042434  }
  0x2f   :  { %v236_v27 = vadd.f32 %v235_v21, %v234_v22  ;;  %v241_v32 = vsel %vm231_vm0, %v228_v25, 0.0  ;;  %v243_v34 = vsel %vm231_vm0, %v229_v28, 0.0  ;;  %vm697_vm4 = vcmask 1043459  }
  0x30   :  { %v245_v36 = vsel %vm231_vm0, %v230_v31, 0.0  ;;  %vm699_vm5 = vcmask 1044484   ;;  %vm701_vm6 = vcmask 1045509   ;;  %vm703_vm7 = vcmask 1046534  }
  0x31   :  { %v238_v30 = vadd.f32 %v237_v26, %v236_v27  ;;  %vm705_vm8 = vcmask 1047559   ;;  %vm707_vm9 = vcmask 64512  }
  0x33   :  { %v240_v33 = vadd.f32 %v239_v29, %v238_v30 }
  0x35   :  { %v242_v35 = vadd.f32 %v241_v32, %v240_v33 }
  0x37   :  { %v244_v37 = vadd.f32 %v243_v34, %v242_v35 }
  0x39   :  { %v246_v38 = vadd.f32 %v245_v36, %v244_v37 }
  0x3b   :  { %v247_v39 = vrot.slane %v246_v38, 4 }
  0x3d   :  { %v248_v40 = vadd.f32 %v247_v39, %v246_v38 }
  0x3f   :  { %v249_v41 = vrot.slane %v248_v40, 2 }
  0x41   :  { %v250_v42 = vadd.f32 %v249_v41, %v248_v40 }
  0x43   :  { %v251_v43 = vrot.slane %v250_v42, 1 }
  0x45   :  { %v252_v44 = vadd.f32 %v251_v43, %v250_v42 }
  0x47   :  { %1394 = vrcp.f32 %v252_v44 }
  0x54   :  { %v1395_v45 = vpop.eup %1394 }
  0x55   :  { %v254_v46 = vmul.f32 %v1395_v45, %v223_v12  ;;  %v256_v47 = vmul.f32 %v1395_v45, %v225_v14  ;;  %v255_v48 = vmul.f32 %v1395_v45, %v224_v13  ;;  %v257_v49 = vmul.f32 %v1395_v45, %v226_v15 }
  0x56   :  { %v258_v54 = vmul.f32 %v1395_v45, %v227_v18  ;;  %v259_v55 = vmul.f32 %v1395_v45, %v228_v25  ;;  %v260_v58 = vmul.f32 %v1395_v45, %v229_v28  ;;  %v261_v59 = vmul.f32 %v1395_v45, %v230_v31 }
  0x57   :  { %v262_v50 = vsel %vm231_vm0, %v254_v46, 0.0  ;;  %v268_v51 = vsel %vm231_vm0, %v256_v47, 0.0  ;;  %v265_v52 = vsel %vm231_vm0, %v255_v48, 0.0  ;;  %v271_v53 = vsel %vm231_vm0, %v257_v49, 0.0 }
  0x58   :  { %263 = vadd.xlane.f32.xlu0 %v262_v50  ;;  %269 = vadd.xlane.f32.xlu1 %v268_v51  ;;  %v274_v56 = vsel %vm231_vm0, %v258_v54, 0.0  ;;  %v277_v57 = vsel %vm231_vm0, %v259_v55, 0.0  ;;  %v280_v60 = vsel %vm231_vm0, %v260_v58, 0.0  ;;  %v283_v61 = vsel %vm231_vm0, %v261_v59, 0.0 }
  0x5c   :  { %266 = vadd.xlane.f32.xlu0 %v265_v52  ;;  %272 = vadd.xlane.f32.xlu1 %v271_v53 }
  0x60   :  { %275 = vadd.xlane.f32.xlu0 %v274_v56  ;;  %278 = vadd.xlane.f32.xlu1 %v277_v57 }
  0x64   :  { %281 = vadd.xlane.f32.xlu0 %v280_v60  ;;  %284 = vadd.xlane.f32.xlu1 %v283_v61 }
  0xe1   :  { %v264_v62 = vpop.xlane.xlu0 %263  ;;  %v270_v63 = vpop.xlane.xlu1 %269 }
  0xe2   :  { %1396 = vrcp.f32 %v264_v62 }
  0xe3   :  { %1398 = vrcp.f32 %v270_v63 }
  0xe5   :  { %v267_v0 = vpop.xlane.xlu0 %266  ;;  %v273_v1 = vpop.xlane.xlu1 %272 }
  0xe6   :  { %1400 = vrcp.f32 %v267_v0 }
  0xe7   :  { %1402 = vrcp.f32 %v273_v1 }
  0xe9   :  { %v276_v2 = vpop.xlane.xlu0 %275  ;;  %v279_v3 = vpop.xlane.xlu1 %278 }
  0xea   :  { %1404 = vrcp.f32 %v276_v2 }
  0xeb   :  { %1406 = vrcp.f32 %v279_v3 }
  0xed   :  { %v282_v4 = vpop.xlane.xlu0 %281  ;;  %v285_v5 = vpop.xlane.xlu1 %284 }
  0xee   :  { %1408 = vrcp.f32 %v282_v4 }
  0xef   :  { %v1397_v6 = vpop.eup %1396  ;;  %1410 = vrcp.f32 %v285_v5 }
  0xf0   :  { %v1399_v7 = vpop.eup %1398  ;;  %v294_v8 = vmul.f32 %v1397_v6, %v254_v46 }
  0xf1   :  { %v296_v12 = vmul.f32 %v1399_v7, %v256_v47 }
  0xf2   :  { %v302_v14 = vsel %vm231_vm0, %v294_v8, 0.0 }
  0xf3   :  { %v1401_v9 = vpop.eup %1400  ;;  %v305_v20 = vsel %vm231_vm0, %v296_v12, 0.0 }
  0xf4   :  { %v1403_v10 = vpop.eup %1402  ;;  %v295_v11 = vmul.f32 %v1401_v9, %v255_v48 }
  0xf5   :  { %v297_v13 = vmul.f32 %v1403_v10, %v257_v49 }
  0xf6   :  { %v303_v15 = vsel %vm231_vm0, %v295_v11, 0.0 }
  0xf7   :  { %v1405_v16 = vpop.eup %1404  ;;  %v304_v17 = vadd.f32 %v303_v15, %v302_v14  ;;  %v307_v21 = vsel %vm231_vm0, %v297_v13, 0.0 }
  0xf8   :  { %v1407_v18 = vpop.eup %1406  ;;  %v298_v19 = vmul.f32 %v1405_v16, %v258_v54 }
  0xf9   :  { %v299_v22 = vmul.f32 %v1407_v18, %v259_v55  ;;  %v306_v23 = vadd.f32 %v305_v20, %v304_v17 }
  0xfa   :  { %v309_v24 = vsel %vm231_vm0, %v298_v19, 0.0 }
  0xfb   :  { %v1409_v25 = vpop.eup %1408  ;;  %v308_v26 = vadd.f32 %v307_v21, %v306_v23  ;;  %v311_v29 = vsel %vm231_vm0, %v299_v22, 0.0 }
  0xfc   :  { %v1411_v27 = vpop.eup %1410  ;;  %v300_v28 = vmul.f32 %v1409_v25, %v260_v58 }
  0xfd   :  { %v301_v30 = vmul.f32 %v1411_v27, %v261_v59  ;;  %v310_v31 = vadd.f32 %v309_v24, %v308_v26 }
  0xfe   :  { %v313_v32 = vsel %vm231_vm0, %v300_v28, 0.0 }
  0xff   :  { %v312_v33 = vadd.f32 %v311_v29, %v310_v31  ;;  %v315_v34 = vsel %vm231_vm0, %v301_v30, 0.0 }
 0x101   :  { %v314_v35 = vadd.f32 %v313_v32, %v312_v33 }
 0x103   :  { %v316_v36 = vadd.f32 %v315_v34, %v314_v35 }
 0x105   :  { %v317_v37 = vrot.slane %v316_v36, 4 }
 0x107   :  { %v318_v38 = vadd.f32 %v317_v37, %v316_v36 }
 0x109   :  { %v319_v39 = vrot.slane %v318_v38, 2 }
 0x10b   :  { %v320_v40 = vadd.f32 %v319_v39, %v318_v38 }
 0x10d   :  { %v321_v41 = vrot.slane %v320_v40, 1 }
 0x10f   :  { %v322_v42 = vadd.f32 %v321_v41, %v320_v40 }
 0x111   :  { %1412 = vrcp.f32 %v322_v42 }
 0x11e   :  { %v1413_v43 = vpop.eup %1412 }
 0x11f   :  { %v325_v44 = vmul.f32 %v1413_v43, %v295_v11  ;;  %v324_v45 = vmul.f32 %v1413_v43, %v294_v8  ;;  %v327_v48 = vmul.f32 %v1413_v43, %v297_v13  ;;  %v326_v49 = vmul.f32 %v1413_v43, %v296_v12 }
 0x120   :  { %v329_v52 = vmul.f32 %v1413_v43, %v299_v22  ;;  %v328_v53 = vmul.f32 %v1413_v43, %v298_v19  ;;  %v331_v56 = vmul.f32 %v1413_v43, %v301_v30  ;;  %v330_v57 = vmul.f32 %v1413_v43, %v300_v28 }
 0x121   :  { %v335_v46 = vsel %vm231_vm0, %v325_v44, 0.0  ;;  %v332_v47 = vsel %vm231_vm0, %v324_v45, 0.0  ;;  %v341_v50 = vsel %vm231_vm0, %v327_v48, 0.0  ;;  %v338_v51 = vsel %vm231_vm0, %v326_v49, 0.0 }
 0x122   :  { %336 = vadd.xlane.f32.xlu1 %v335_v46  ;;  %333 = vadd.xlane.f32.xlu0 %v332_v47  ;;  %v347_v54 = vsel %vm231_vm0, %v329_v52, 0.0  ;;  %v344_v55 = vsel %vm231_vm0, %v328_v53, 0.0  ;;  %v353_v58 = vsel %vm231_vm0, %v331_v56, 0.0  ;;  %v350_v59 = vsel %vm231_vm0, %v330_v57, 0.0 }
 0x126   :  { %342 = vadd.xlane.f32.xlu1 %v341_v50  ;;  %339 = vadd.xlane.f32.xlu0 %v338_v51 }
 0x12a   :  { %348 = vadd.xlane.f32.xlu1 %v347_v54  ;;  %345 = vadd.xlane.f32.xlu0 %v344_v55 }
 0x12e   :  { %354 = vadd.xlane.f32.xlu1 %v353_v58  ;;  %351 = vadd.xlane.f32.xlu0 %v350_v59 }
 0x1ab   :  { %v337_v60 = vpop.xlane.xlu1 %336  ;;  %v334_v61 = vpop.xlane.xlu0 %333 }
 0x1ac   :  { %1414 = vrcp.f32 %v337_v60 }
 0x1ad   :  { %1416 = vrcp.f32 %v334_v61 }
 0x1af   :  { %v343_v62 = vpop.xlane.xlu1 %342  ;;  %v340_v63 = vpop.xlane.xlu0 %339 }
 0x1b0   :  { %1418 = vrcp.f32 %v343_v62 }
 0x1b1   :  { %1420 = vrcp.f32 %v340_v63 }
 0x1b3   :  { %v349_v0 = vpop.xlane.xlu1 %348  ;;  %v346_v1 = vpop.xlane.xlu0 %345 }
 0x1b4   :  { %1422 = vrcp.f32 %v349_v0 }
 0x1b5   :  { %1424 = vrcp.f32 %v346_v1 }
 0x1b7   :  { %v355_v2 = vpop.xlane.xlu1 %354  ;;  %v352_v3 = vpop.xlane.xlu0 %351 }
 0x1b8   :  { %1426 = vrcp.f32 %v355_v2 }
 0x1b9   :  { %v1415_v4 = vpop.eup %1414  ;;  %1428 = vrcp.f32 %v352_v3 }
 0x1ba   :  { %v1417_v5 = vpop.eup %1416  ;;  %v365_v6 = vmul.f32 %v1415_v4, %v325_v44 }
 0x1bb   :  { %v364_v7 = vmul.f32 %v1417_v5, %v324_v45 }
 0x1bc   :  { %v373_v10 = vsel %vm231_vm0, %v365_v6, 0.0 }
 0x1bd   :  { %v1419_v8 = vpop.eup %1418  ;;  %v372_v9 = vsel %vm231_vm0, %v364_v7, 0.0 }
 0x1be   :  { %v1421_v11 = vpop.eup %1420  ;;  %v367_v13 = vmul.f32 %v1419_v8, %v327_v48  ;;  %v374_v14 = vadd.f32 %v373_v10, %v372_v9 }
 0x1bf   :  { %v366_v12 = vmul.f32 %v1421_v11, %v326_v49 }
 0x1c0   :  { %v377_v21 = vsel %vm231_vm0, %v367_v13, 0.0 }
 0x1c1   :  { %v1423_v15 = vpop.eup %1422  ;;  %v375_v16 = vsel %vm231_vm0, %v366_v12, 0.0 }
 0x1c2   :  { %v1425_v17 = vpop.eup %1424  ;;  %v376_v18 = vadd.f32 %v375_v16, %v374_v14  ;;  %v369_v19 = vmul.f32 %v1423_v15, %v329_v52 }
 0x1c3   :  { %v368_v20 = vmul.f32 %v1425_v17, %v328_v53 }
 0x1c4   :  { %v378_v22 = vadd.f32 %v377_v21, %v376_v18  ;;  %v381_v29 = vsel %vm231_vm0, %v369_v19, 0.0 }
 0x1c5   :  { %v1427_v23 = vpop.eup %1426  ;;  %v379_v24 = vsel %vm231_vm0, %v368_v20, 0.0 }
 0x1c6   :  { %v1429_v25 = vpop.eup %1428  ;;  %v380_v26 = vadd.f32 %v379_v24, %v378_v22  ;;  %v371_v27 = vmul.f32 %v1427_v23, %v331_v56 }
 0x1c7   :  { %v370_v28 = vmul.f32 %v1429_v25, %v330_v57 }
 0x1c8   :  { %v382_v30 = vadd.f32 %v381_v29, %v380_v26  ;;  %v385_v33 = vsel %vm231_vm0, %v371_v27, 0.0 }
 0x1c9   :  { %v383_v31 = vsel %vm231_vm0, %v370_v28, 0.0 }
 0x1ca   :  { %v384_v32 = vadd.f32 %v383_v31, %v382_v30 }
 0x1cc   :  { %v386_v34 = vadd.f32 %v385_v33, %v384_v32 }
 0x1ce   :  { %v387_v35 = vrot.slane %v386_v34, 4 }
 0x1d0   :  { %v388_v36 = vadd.f32 %v387_v35, %v386_v34  ;;  %v1116_v34 = vld [vmem:[%s1756_s1] ss:$0 sm:$0xff] }
 0x1d2   :  { %v389_v37 = vrot.slane %v388_v36, 2 }
 0x1d4   :  { %v390_v38 = vadd.f32 %v389_v37, %v388_v36 }
 0x1d6   :  { %v391_v39 = vrot.slane %v390_v38, 1 }
 0x1d8   :  { %v392_v40 = vadd.f32 %v391_v39, %v390_v38 }
 0x1da   :  { %1430 = vrcp.f32 %v392_v40 }
 0x1e7   :  { %v1431_v41 = vpop.eup %1430 }
 0x1e8   :  { %v395_v42 = vmul.f32 %v1431_v41, %v365_v6  ;;  %v394_v43 = vmul.f32 %v1431_v41, %v364_v7  ;;  %v397_v46 = vmul.f32 %v1431_v41, %v367_v13  ;;  %v396_v47 = vmul.f32 %v1431_v41, %v366_v12 }
 0x1e9   :  { %v399_v50 = vmul.f32 %v1431_v41, %v369_v19  ;;  %v398_v51 = vmul.f32 %v1431_v41, %v368_v20  ;;  %v401_v54 = vmul.f32 %v1431_v41, %v371_v27  ;;  %v400_v55 = vmul.f32 %v1431_v41, %v370_v28 }
 0x1ea   :  { %v405_v44 = vsel %vm231_vm0, %v395_v42, 0.0  ;;  %v402_v45 = vsel %vm231_vm0, %v394_v43, 0.0  ;;  %v411_v48 = vsel %vm231_vm0, %v397_v46, 0.0  ;;  %v408_v49 = vsel %vm231_vm0, %v396_v47, 0.0 }
 0x1eb   :  { %406 = vadd.xlane.f32.xlu1 %v405_v44  ;;  %403 = vadd.xlane.f32.xlu0 %v402_v45  ;;  %v417_v52 = vsel %vm231_vm0, %v399_v50, 0.0  ;;  %v414_v53 = vsel %vm231_vm0, %v398_v51, 0.0  ;;  %v423_v56 = vsel %vm231_vm0, %v401_v54, 0.0  ;;  %v420_v57 = vsel %vm231_vm0, %v400_v55, 0.0 }
 0x1ef   :  { %412 = vadd.xlane.f32.xlu1 %v411_v48  ;;  %409 = vadd.xlane.f32.xlu0 %v408_v49 }
 0x1f3   :  { %418 = vadd.xlane.f32.xlu1 %v417_v52  ;;  %415 = vadd.xlane.f32.xlu0 %v414_v53 }
 0x1f7   :  { %424 = vadd.xlane.f32.xlu1 %v423_v56  ;;  %421 = vadd.xlane.f32.xlu0 %v420_v57 }
 0x274   :  { %v404_v58 = vpop.xlane.xlu0 %403  ;;  %v407_v59 = vpop.xlane.xlu1 %406 }
 0x275   :  { %1432 = vrcp.f32 %v404_v58  ;;  %v650_v58 = vld [vmem:[%s1758_s3] sm:$0xff] }
 0x276   :  { %1434 = vrcp.f32 %v407_v59  ;;  %v1497_v59 = vmov 0.0  }
 0x278   :  { %v410_v60 = vpop.xlane.xlu0 %409  ;;  %v413_v61 = vpop.xlane.xlu1 %412 }
 0x279   :  { %1436 = vrcp.f32 %v410_v60 }
 0x27a   :  { %1438 = vrcp.f32 %v413_v61 }
 0x27c   :  { %v416_v62 = vpop.xlane.xlu0 %415  ;;  %v419_v2 = vpop.xlane.xlu1 %418 }
 0x27d   :  { %1440 = vrcp.f32 %v416_v62 }
 0x27e   :  { %1442 = vrcp.f32 %v419_v2 }
 0x280   :  { %v422_v5 = vpop.xlane.xlu0 %421  ;;  %v425_v8 = vpop.xlane.xlu1 %424 }
 0x281   :  { %1444 = vrcp.f32 %v422_v5 }
 0x282   :  { %v1433_v63 = vpop.eup %1432  ;;  %1446 = vrcp.f32 %v425_v8 }
 0x283   :  { %v434_v0 = vmul.f32 %v1433_v63, %v394_v43  ;;  %v1435_v1 = vpop.eup %1434  ;;  %v659_v63 = vlaneseq }
 0x284   :  { %v435_v3 = vmul.f32 %v1435_v1, %v395_v42 }
 0x285   :  { %442 = vxpose.xlu0.b32.start [1/8] (short) (narrow) %v434_v0, 64  ;;  %v660_v1 = vand.u32 127, %v659_v63  ;;  %v662_v2 = vshrl.u32 %v659_v63, 7 }
 0x286   :  { %v1437_v4 = vpop.eup %1436 }
 0x287   :  { %v436_v6 = vmul.f32 %v1437_v4, %v396_v47  ;;  %v1439_v7 = vpop.eup %1438  ;;  %v663_v4 = vsub.s32 %v660_v1, %v662_v2 }
 0x288   :  { %v437_v9 = vmul.f32 %v1439_v7, %v397_v46 }
 0x289   :  { %443 = vxpose.xlu0.b32.cont [2/8] (short) (narrow) %v435_v3, 64 }
 0x28a   :  { %v1441_v10 = vpop.eup %1440 }
 0x28b   :  { %v438_v11 = vmul.f32 %v1441_v10, %v398_v51  ;;  %v1443_v12 = vpop.eup %1442 }
 0x28c   :  { %v439_v13 = vmul.f32 %v1443_v12, %v399_v50 }
 0x28d   :  { %444 = vxpose.xlu0.b32.cont [3/8] (short) (narrow) %v436_v6, 64 }
 0x28e   :  { %v1445_v14 = vpop.eup %1444 }
 0x28f   :  { %v440_v15 = vmul.f32 %v1445_v14, %v400_v55  ;;  %v1447_v16 = vpop.eup %1446 }
 0x290   :  { %v441_v17 = vmul.f32 %v1447_v16, %v401_v54 }
 0x291   :  { %445 = vxpose.xlu0.b32.cont [4/8] (short) (narrow) %v437_v9, 64 }
 0x295   :  { %446 = vxpose.xlu0.b32.cont [5/8] (short) (narrow) %v438_v11, 64 }
 0x299   :  { %447 = vxpose.xlu0.b32.cont [6/8] (short) (narrow) %v439_v13, 64 }
 0x29d   :  { %448 = vxpose.xlu0.b32.cont [7/8] (short) (narrow) %v440_v15, 64 }
 0x2a1   :  { %449 = vxpose.xlu0.b32.end [8/8] (short) (narrow) %v441_v17, 64 }
 0x301   :  { %v458_v18 = vpop.trf.xlu0 }
 0x302   :  { %v474_v19 = vadd.f32 %v458_v18, %v434_v0 }
 0x304   :  { %1337 = vmatprep.mubr.msk.f32.mxu0 %vm231_vm0, %v474_v19 }
 0x305   :  { %v459_v20 = vpop.trf.xlu0 }
 0x306   :  { %v475_v33 = vadd.f32 %v459_v20, %v435_v3 }
 0x309   :  { %v460_v21 = vpop.trf.xlu0 }
 0x30a   :  { %v476_v32 = vadd.f32 %v460_v21, %v436_v6 }
 0x30d   :  { %v461_v22 = vpop.trf.xlu0 }
 0x30e   :  { %v477_v31 = vadd.f32 %v461_v22, %v437_v9 }
 0x311   :  { %v462_v23 = vpop.trf.xlu0 }
 0x312   :  { %v478_v30 = vadd.f32 %v462_v23, %v438_v11 }
 0x315   :  { %v463_v24 = vpop.trf.xlu0 }
 0x316   :  { %v479_v29 = vadd.f32 %v463_v24, %v439_v13  ;;  %v780_v24 = vld [vmem:[%s1757_s2] sm:$0xff] }
 0x317   :  { %1356 = vmatprep.mubr.msk.f32.mxu1 %vm707_vm9, %v780_v24 }
 0x319   :  { %v464_v25 = vpop.trf.xlu0 }
 0x31a   :  { %v480_v28 = vadd.f32 %v464_v25, %v440_v15 }
 0x31d   :  { %v465_v26 = vpop.trf.xlu0 }
 0x31e   :  { %v481_v27 = vadd.f32 %v465_v26, %v441_v17  ;;  %v781_v26 = vld [vmem:[%s1757_s2 + $0x8] sm:$0xff] }
 0x320   :  { %1321 = vmatprep.subr.mxu0 %v481_v27 }
 0x321   :  { %1322 = vmatpush3.msra.mxu0 %v481_v27 }
 0x322   :  { %1323 = vmatprep.subr.mxu0 %v480_v28 }
 0x323   :  { %1324 = vmatpush3.msra.mxu0 %v480_v28 }
 0x324   :  { %1325 = vmatprep.subr.mxu0 %v479_v29 }
 0x325   :  { %1326 = vmatpush3.msra.mxu0 %v479_v29 }
 0x326   :  { %1327 = vmatprep.subr.mxu0 %v478_v30 }
 0x327   :  { %1328 = vmatpush3.msra.mxu0 %v478_v30 }
 0x328   :  { %1329 = vmatprep.subr.mxu0 %v477_v31 }
 0x329   :  { %1330 = vmatpush3.msra.mxu0 %v477_v31 }
 0x32a   :  { %1331 = vmatprep.subr.mxu0 %v476_v32 }
 0x32b   :  { %1332 = vmatpush3.msra.mxu0 %v476_v32 }
 0x32c   :  { %1333 = vmatprep.subr.mxu0 %v475_v33 }
 0x32d   :  { %1334 = vmatpush3.msra.mxu0 %v475_v33 }
 0x32e   :  { %1335 = vmatprep.subr.mxu0 %v474_v19 }
 0x32f   :  { %1336 = vmatpush3.msra.mxu0 %v474_v19 }
 0x330   :  { %1338 = vmatmul.mubr.msk.f32.vlgmr.msra.gmra.mxu0 %vm231_vm0, %v475_v33  ;;  %1349 = vmatprep.subr.mxu0 %v1497_v59  ;;  %v787_v33 = vld [vmem:[%s1757_s2 + $0x38] sm:$0xff] }
 0x331   :  { %1340 = vmatprep.mubr.msk.f32.mxu0 %vm231_vm0, %v476_v32  ;;  %1350 = vmatpush3.msra.mxu0 %v650_v58  ;;  %v786_v32 = vld [vmem:[%s1757_s2 + $0x30] sm:$0xff] }
 0x334   :  { %1341 = vmatmul.mubr.msk.f32.gmra.mxu0 %vm231_vm0, %v477_v31  ;;  %v785_v31 = vld [vmem:[%s1757_s2 + $0x28] sm:$0xff] }
 0x335   :  { %1343 = vmatprep.mubr.msk.f32.mxu0 %vm231_vm0, %v478_v30  ;;  %v784_v30 = vld [vmem:[%s1757_s2 + $0x20] sm:$0xff] }
 0x338   :  { %1344 = vmatmul.mubr.msk.f32.gmra.mxu0 %vm231_vm0, %v479_v29  ;;  %v783_v29 = vld [vmem:[%s1757_s2 + $0x18] sm:$0xff] }
 0x339   :  { %1346 = vmatprep.mubr.msk.f32.mxu0 %vm231_vm0, %v480_v28 }
 0x33c   :  { %1347 = vmatmul.mubr.msk.f32.gmra.mxu0 %vm231_vm0, %v481_v27  ;;  %v782_v27 = vld [vmem:[%s1757_s2 + $0x10] sm:$0xff] }
 0x33d   :  { %1351 = vmatprep.mubr.msk.f32.mxu0 %vm1498_vm1, %v1497_v59 }
 0x3f0   :  { %v1339_v35 = vpop.f32.mrf.mxu0 }
 0x3f1   :  { %v619_v36 = vmul.f32 %v1339_v35, %v1116_v34  ;;  %v789_v35 = vld [vmem:[%s1757_s2 + $0x48] sm:$0xff] }
 0x3f2   :  { %v572_v37 = vpop.f32.mrf.mxu0 }
 0x3f3   :  { %v618_v38 = vmul.f32 %v1116_v34, %v572_v37  ;;  %v629_v39 = vsel %vm231_vm0, %v619_v36, 0.0  ;;  %v790_v36 = vld [vmem:[%s1757_s2 + $0x50] sm:$0xff]  ;;  %v791_v37 = vld [vmem:[%s1757_s2 + $0x58] sm:$0xff] }
 0x3f4   :  { %630 = vadd.xlane.f32.xlu1 %v629_v39  ;;  %v1342_v40 = vpop.f32.mrf.mxu0  ;;  %v793_v39 = vld [vmem:[%s1757_s2 + $0x68] sm:$0xff] }
 0x3f5   :  { %v621_v42 = vmul.f32 %v1342_v40, %v1116_v34  ;;  %v626_v43 = vsel %vm231_vm0, %v618_v38, 0.0  ;;  %v792_v38 = vld [vmem:[%s1757_s2 + $0x60] sm:$0xff]  ;;  %v794_v40 = vld [vmem:[%s1757_s2 + $0x70] sm:$0xff] }
 0x3f6   :  { %v582_v41 = vpop.f32.mrf.mxu0 }
 0x3f7   :  { %v620_v45 = vmul.f32 %v1116_v34, %v582_v41  ;;  %v635_v46 = vsel %vm231_vm0, %v621_v42, 0.0  ;;  %v795_v41 = vld [vmem:[%s1757_s2 + $0x78] sm:$0xff] }
 0x3f8   :  { %627 = vadd.xlane.f32.xlu1 %v626_v43  ;;  %v1345_v44 = vpop.f32.mrf.mxu0 }
 0x3f9   :  { %v623_v48 = vmul.f32 %v1345_v44, %v1116_v34  ;;  %v632_v49 = vsel %vm231_vm0, %v620_v45, 0.0 }
 0x3fa   :  { %v592_v47 = vpop.f32.mrf.mxu0 }
 0x3fb   :  { %v622_v51 = vmul.f32 %v1116_v34, %v592_v47  ;;  %v641_v52 = vsel %vm231_vm0, %v623_v48, 0.0 }
 0x3fc   :  { %636 = vadd.xlane.f32.xlu1 %v635_v46  ;;  %v1348_v50 = vpop.f32.mrf.mxu0 }
 0x3fd   :  { %v638_v55 = vsel %vm231_vm0, %v622_v51, 0.0  ;;  %v625_v56 = vmul.f32 %v1348_v50, %v1116_v34 }
 0x3fe   :  { %v602_v53 = vpop.f32.mrf.mxu0 }
 0x3ff   :  { %v624_v54 = vmul.f32 %v1116_v34, %v602_v53  ;;  %v647_v60 = vsel %vm231_vm0, %v625_v56, 0.0  ;;  %v788_v34 = vld [vmem:[%s1757_s2 + $0x40] sm:$0xff] }
 0x400   :  { %633 = vadd.xlane.f32.xlu1 %v632_v49 }
 0x401   :  { %v644_v57 = vsel %vm231_vm0, %v624_v54, 0.0 }
 0x404   :  { %642 = vadd.xlane.f32.xlu1 %v641_v52 }
 0x408   :  { %639 = vadd.xlane.f32.xlu1 %v638_v55 }
 0x40c   :  { %645 = vadd.xlane.f32.xlu1 %v644_v57 }
 0x410   :  { %648 = vadd.xlane.f32.xlu1 %v647_v60 }
 0x47d   :  { %v631_v61 = vpop.xlane.xlu1 %630 }
 0x47e   :  { %v668_v8 = vrot.slane %v631_v61, %v663_v4 }
 0x481   :  { %v628_v62 = vpop.xlane.xlu1 %627 }
 0x482   :  { %v664_v6 = vrot.slane %v628_v62, %v663_v4 }
 0x484   :  { %v694_v10 = vsel %vm693_vm2, %v668_v8, %v664_v6 }
 0x485   :  { %v637_v0 = vpop.xlane.xlu1 %636 }
 0x486   :  { %v676_v13 = vrot.slane %v637_v0, %v663_v4 }
 0x489   :  { %v634_v3 = vpop.xlane.xlu1 %633 }
 0x48a   :  { %v672_v7 = vrot.slane %v634_v3, %v663_v4 }
 0x48c   :  { %v696_v11 = vsel %vm695_vm3, %v672_v7, %v694_v10 }
 0x48d   :  { %v643_v5 = vpop.xlane.xlu1 %642  ;;  %v698_v15 = vsel %vm697_vm4, %v676_v13, %v696_v11 }
 0x48e   :  { %v684_v18 = vrot.slane %v643_v5, %v663_v4 }
 0x491   :  { %v640_v9 = vpop.xlane.xlu1 %639 }
 0x492   :  { %v680_v12 = vrot.slane %v640_v9, %v663_v4 }
 0x494   :  { %v700_v16 = vsel %vm699_vm5, %v680_v12, %v698_v15 }
 0x495   :  { %v646_v14 = vpop.xlane.xlu1 %645  ;;  %v702_v20 = vsel %vm701_vm6, %v684_v18, %v700_v16 }
 0x496   :  { %v688_v17 = vrot.slane %v646_v14, %v663_v4 }
 0x498   :  { %v704_v22 = vsel %vm703_vm7, %v688_v17, %v702_v20 }
 0x499   :  { %v649_v19 = vpop.xlane.xlu1 %648 }
 0x49a   :  { %v692_v21 = vrot.slane %v649_v19, %v663_v4 }
 0x49c   :  { %v706_v23 = vsel %vm705_vm8, %v692_v21, %v704_v22 }
 0x49d   :  { %1352 = vmatmul.mubr.msk.f32.vlgmr.msra.gmra.mxu0 %vm707_vm9, %v706_v23 }
 0x55d   :  { %v776_v25 = vpop.f32.mrf.mxu0 }
 0x55e   :  { %1354 = vmatprep.subr.mxu1 %v776_v25 }
 0x55f   :  { %v1353_v28 = vpop.f32.mrf.mxu0  ;;  %1355 = vmatpush3.msra.mxu1 %v776_v25 }
 0x560   :  { %1357 = vmatmul.mubr.msk.f32.vlgmr.msra.gmra.mxu1 %vm707_vm9, %v781_v26 }
 0x561   :  { %1359 = vmatprep.mubr.msk.f32.mxu1 %vm707_vm9, %v782_v27 }
 0x564   :  { %1360 = vmatmul.mubr.msk.f32.gmra.mxu1 %vm707_vm9, %v783_v29 }
 0x565   :  { %1362 = vmatprep.mubr.msk.f32.mxu1 %vm707_vm9, %v784_v30 }
 0x568   :  { %1363 = vmatmul.mubr.msk.f32.gmra.mxu1 %vm707_vm9, %v785_v31 }
 0x569   :  { %1365 = vmatprep.mubr.msk.f32.mxu1 %vm707_vm9, %v786_v32 }
 0x56c   :  { %1366 = vmatmul.mubr.msk.f32.gmra.mxu1 %vm707_vm9, %v787_v33 }
 0x56d   :  { %1368 = vmatprep.mubr.msk.f32.mxu1 %vm707_vm9, %v788_v34 }
 0x570   :  { %1369 = vmatmul.mubr.msk.f32.gmra.mxu1 %vm707_vm9, %v789_v35 }
 0x571   :  { %1371 = vmatprep.mubr.msk.f32.mxu1 %vm707_vm9, %v790_v36 }
 0x574   :  { %1372 = vmatmul.mubr.msk.f32.gmra.mxu1 %vm707_vm9, %v791_v37 }
 0x575   :  { %1374 = vmatprep.mubr.msk.f32.mxu1 %vm707_vm9, %v792_v38 }
 0x578   :  { %1375 = vmatmul.mubr.msk.f32.gmra.mxu1 %vm707_vm9, %v793_v39 }
 0x579   :  { %1377 = vmatprep.mubr.msk.f32.mxu1 %vm707_vm9, %v794_v40 }
 0x57c   :  { %1378 = vmatmul.mubr.msk.f32.gmra.mxu1 %vm707_vm9, %v795_v41 }
 0x620   :  { %v1665_v42 = vpop.f32.mrf.mxu1 }
 0x622   :  { %v1667_v43 = vpop.f32.mrf.mxu1 }
 0x624   :  { %v1669_v44 = vpop.f32.mrf.mxu1 }
 0x626   :  { %v1671_v45 = vpop.f32.mrf.mxu1 }
 0x628   :  { %v1673_v46 = vpop.f32.mrf.mxu1 }
 0x629   :  { %v990_v56 = vmin.f32 %v1665_v42, %v1673_v46  ;;  %v1014_v6 = vmax.f32 %v1665_v42, %v1673_v46 }
 0x62a   :  { %v1675_v47 = vpop.f32.mrf.mxu1 }
 0x62b   :  { %v989_v55 = vmin.f32 %v1667_v43, %v1675_v47  ;;  %v1013_v62 = vmax.f32 %v1667_v43, %v1675_v47 }
 0x62c   :  { %v1677_v48 = vpop.f32.mrf.mxu1 }
 0x62d   :  { %v992_v58 = vmin.f32 %v1669_v44, %v1677_v48  ;;  %v1016_v63 = vmax.f32 %v1669_v44, %v1677_v48 }
 0x62e   :  { %v1679_v49 = vpop.f32.mrf.mxu1 }
 0x62f   :  { %v991_v59 = vmin.f32 %v1671_v45, %v1679_v49  ;;  %v1015_v60 = vmax.f32 %v1671_v45, %v1679_v49 }
 0x630   :  { %v1681_v50 = vpop.f32.mrf.mxu1 }
 0x631   :  { %v994_v0 = vmin.f32 %v990_v56, %v1681_v50  ;;  %v1018_v14 = vmax.f32 %v1014_v6, %v1681_v50 }
 0x632   :  { %v1683_v51 = vpop.f32.mrf.mxu1 }
 0x633   :  { %v993_v61 = vmin.f32 %v989_v55, %v1683_v51  ;;  %v1017_v7 = vmax.f32 %v1013_v62, %v1683_v51 }
 0x634   :  { %v1685_v52 = vpop.f32.mrf.mxu1 }
 0x635   :  { %v996_v2 = vmin.f32 %v992_v58, %v1685_v52  ;;  %v1020_v8 = vmax.f32 %v1016_v63, %v1685_v52 }
 0x636   :  { %v1687_v53 = vpop.f32.mrf.mxu1 }
 0x637   :  { %v995_v3 = vmin.f32 %v991_v59, %v1687_v53  ;;  %v1019_v4 = vmax.f32 %v1015_v60, %v1687_v53 }
 0x638   :  { %v1689_v54 = vpop.f32.mrf.mxu1 }
 0x639   :  { %v998_v10 = vmin.f32 %v994_v0, %v1689_v54  ;;  %v1022_v19 = vmax.f32 %v1018_v14, %v1689_v54 }
 0x63a   :  { %v1695_v57 = vpop.f32.mrf.mxu1 }
 0x63b   :  { %v997_v5 = vmin.f32 %v993_v61, %v1695_v57  ;;  %v1021_v15 = vmax.f32 %v1017_v7, %v1695_v57 }
 0x63c   :  { %v1709_v1 = vpop.f32.mrf.mxu1 }
 0x63d   :  { %v1000_v11 = vmin.f32 %v996_v2, %v1709_v1  ;;  %v1024_v16 = vmax.f32 %v1020_v8, %v1709_v1  ;;  %v1001_v17 = vmin.f32 %v997_v5, %v998_v10  ;;  %v1025_v22 = vmax.f32 %v1021_v15, %v1022_v19 }
 0x63e   :  { %v1719_v9 = vpop.f32.mrf.mxu1 }
 0x63f   :  { %v999_v12 = vmin.f32 %v995_v3, %v1719_v9  ;;  %v1023_v13 = vmax.f32 %v1019_v4, %v1719_v9 }
 0x641   :  { %v1002_v18 = vmin.f32 %v999_v12, %v1000_v11  ;;  %v1026_v21 = vmax.f32 %v1023_v13, %v1024_v16 }
 0x643   :  { %v1003_v20 = vmin.f32 %v1001_v17, %v1002_v18  ;;  %v1027_v23 = vmax.f32 %v1025_v22, %v1026_v21 }
 0x645   :  { %1004 = vmin.xlane.f32.xlu1 %v1003_v20 }
 0x649   :  { %1028 = vmax.xlane.f32.xlu1 %v1027_v23 }
 0x6ce   :  { %v1005_v24 = vpop.xlane.xlu1 %1004 }
 0x6cf   :  { %v1006_v25 = vrot.slane %v1005_v24, 4 }
 0x6d1   :  { %v1007_v26 = vmin.f32 %v1005_v24, %v1006_v25 }
 0x6d2   :  { %v1029_v27 = vpop.xlane.xlu1 %1028 }
 0x6d3   :  { %v1008_v28 = vrot.slane %v1007_v26, 2  ;;  %v1030_v29 = vrot.slane %v1029_v27, 4 }
 0x6d5   :  { %v1031_v30 = vmax.f32 %v1029_v27, %v1030_v29  ;;  %v1009_v31 = vmin.f32 %v1007_v26, %v1008_v28 }
 0x6d7   :  { %v1032_v32 = vrot.slane %v1031_v30, 2  ;;  %v1010_v33 = vrot.slane %v1009_v31, 1 }
 0x6d9   :  { %v1033_v34 = vmax.f32 %v1031_v30, %v1032_v32  ;;  %v1011_v35 = vmin.f32 %v1009_v31, %v1010_v33 }
 0x6db   :  { %1380 = vpush %v1011_v35  ;;  %v1034_v36 = vrot.slane %v1033_v34, 1 }
 0x6dd   :  { %v1035_v37 = vmax.f32 %v1033_v34, %v1034_v36 }
 0x6df   :  { %1382 = vpush %v1035_v37 }
 0x70c   :  { %s1381_s2 = spop %1380 }
 0x70d   :  { %v1037_v40 = vstv %s1381_s2 }
 0x70e   :  { %v1038_v41 = vsub.f32 %v1667_v43, %v1037_v40  ;;  %v1039_v55 = vsub.f32 %v1665_v42, %v1037_v40  ;;  %v1040_v56 = vsub.f32 %v1671_v45, %v1037_v40  ;;  %v1041_v58 = vsub.f32 %v1669_v44, %v1037_v40 }
 0x70f   :  { %v1042_v59 = vsub.f32 %v1675_v47, %v1037_v40  ;;  %v1043_v60 = vsub.f32 %v1673_v46, %v1037_v40  ;;  %v1044_v61 = vsub.f32 %v1679_v49, %v1037_v40  ;;  %v1045_v62 = vsub.f32 %v1677_v48, %v1037_v40 }
 0x710   :  { %s1383_s26 = spop %1382  ;;  %v1046_v63 = vsub.f32 %v1683_v51, %v1037_v40  ;;  %v1047_v0 = vsub.f32 %v1681_v50, %v1037_v40  ;;  %v1048_v43 = vsub.f32 %v1687_v53, %v1037_v40  ;;  %v1049_v42 = vsub.f32 %v1685_v52, %v1037_v40 }
 0x711   :  { %s1054_s27 = ssub.f32 %s1383_s26, %s1381_s2  ;;  %v1050_v45 = vsub.f32 %v1695_v57, %v1037_v40  ;;  %v1051_v44 = vsub.f32 %v1689_v54, %v1037_v40  ;;  %v1052_v47 = vsub.f32 %v1719_v9, %v1037_v40  ;;  %v1053_v46 = vsub.f32 %v1709_v1, %v1037_v40 }
 0x713   :  { %v1055_v38 = vstv %s1054_s27 }
 0x714   :  { %1448 = vrcp.f32 %v1055_v38 }
 0x721   :  { %v1449_v39 = vpop.eup %1448 }
 0x722   :  { %1384 = vpush %v1449_v39 }
 0x753   :  { %s1385_s28 = spop %1384 }
 0x754   :  { %v1058_v49 = vstv %s1385_s28 }
 0x755   :  { %v1059_v48 = vmul.f32 %v1058_v49, %v1038_v41  ;;  %v1060_v51 = vmul.f32 %v1058_v49, %v1039_v55  ;;  %v1061_v2 = vmul.f32 %v1058_v49, %v1040_v56  ;;  %v1062_v50 = vmul.f32 %v1058_v49, %v1041_v58 }
 0x756   :  { %v1063_v3 = vmul.f32 %v1058_v49, %v1042_v59  ;;  %v1064_v53 = vmul.f32 %v1058_v49, %v1043_v60  ;;  %v1065_v4 = vmul.f32 %v1058_v49, %v1044_v61  ;;  %v1066_v52 = vmul.f32 %v1058_v49, %v1045_v62 }
 0x757   :  { %v1067_v5 = vmul.f32 %v1058_v49, %v1046_v63  ;;  %v1068_v57 = vmul.f32 %v1058_v49, %v1047_v0  ;;  %v1069_v6 = vmul.f32 %v1058_v49, %v1048_v43  ;;  %v1070_v7 = vmul.f32 %v1058_v49, %v1049_v42  ;;  %1075 = vst [vmem:[#allocation5] sm:$0xff] %v1059_v48 }
 0x758   :  { %1076 = vst [vmem:[#allocation5 + $0x8] sm:$0xff] %v1060_v51  ;;  %1077 = vst [vmem:[#allocation5 + $0x10] sm:$0xff] %v1061_v2  ;;  %v1071_v54 = vmul.f32 %v1058_v49, %v1050_v45  ;;  %v1072_v1 = vmul.f32 %v1058_v49, %v1051_v44  ;;  %v1073_v8 = vmul.f32 %v1058_v49, %v1052_v47 }
 0x759   :  { %1078 = vst [vmem:[#allocation5 + $0x18] sm:$0xff] %v1062_v50  ;;  %v1074_v9 = vmul.f32 %v1058_v49, %v1053_v46  ;;  %1079 = vst [vmem:[#allocation5 + $0x20] sm:$0xff] %v1063_v3 }
 0x75a   :  { %1080 = vst [vmem:[#allocation5 + $0x28] sm:$0xff] %v1064_v53  ;;  %1081 = vst [vmem:[#allocation5 + $0x30] sm:$0xff] %v1065_v4 }
 0x75b   :  { %1082 = vst [vmem:[#allocation5 + $0x38] sm:$0xff] %v1066_v52  ;;  %1083 = vst [vmem:[#allocation5 + $0x40] sm:$0xff] %v1067_v5 }
 0x75c   :  { %1084 = vst [vmem:[#allocation5 + $0x48] sm:$0xff] %v1068_v57  ;;  %1085 = vst [vmem:[#allocation5 + $0x50] sm:$0xff] %v1069_v6 }
 0x75d   :  { %1086 = vst [vmem:[#allocation5 + $0x58] sm:$0xff] %v1070_v7  ;;  %1087 = vst [vmem:[#allocation5 + $0x60] sm:$0xff] %v1071_v54 }
 0x75e   :  { %1088 = vst [vmem:[#allocation5 + $0x68] sm:$0xff] %v1072_v1  ;;  %1089 = vst [vmem:[#allocation5 + $0x70] sm:$0xff] %v1073_v8 }
 0x75f   :  { %1090 = vst [vmem:[#allocation5 + $0x78] sm:$0xff] %v1074_v9 }
 0x760   :  { %1481 = shalt.err (!%p1478_p9)
}
 0x761   :  { %s1500_s6 = smov 128   ;;  %s1501_s7 = smov 8  }
 0x762   :  { %1102 = dma.vmem_to_hbm [thread:$0]  %s1745_s30, 2048, %s1759_s4, [#allocation4], %s1500_s6, %s1500_s6, %s1501_s7  }
 0x763   :  { %1492 = dma.done.wait [#allocation4], 2048  }
 0x764   :  { %1493 = vsyncadd [#allocation4], 4294965248 }
 0x765   :  { %1106 = vsyncpa [#allocation3], 1 }
 0x766   :  { %1107 = vsyncpa [#allocation4], 1 }

</bundles_post_ra>
